<compile_context>
chip_gen: v5e
topology: v5e:2x2
jax: 0.10.0
libtpu: 0.0.40
codegen_flags: <defaults>
</compile_context>

<pallas_src>
import jax
import jax.numpy as jnp
from jax.experimental import pallas as pl
from jax.experimental.pallas import tpu as pltpu

_LANES = 128


def _round_up(x, m):
    return ((x + m - 1) // m) * m


def mlp_kernel(x_ref, w1_ref, b1_ref, w2_ref, b2_ref, out_ref):
    x = x_ref[...]                                   # (TB, F) f32
    # --- Layer 1 on the VPU: contraction dim F is tiny (2), an MXU matmul would be
    #     >98% zero-padding. Unrolled broadcast-FMAs; F is static -> unrolled at trace.
    acc = x[:, 0:1] * w1_ref[0:1, :]                 # (TB,1)*(1,H) -> (TB,H)
    for k in range(1, x.shape[1]):
        acc = acc + x[:, k:k + 1] * w1_ref[k:k + 1, :]
    h = jnp.maximum(acc + b1_ref[...], 0.0)          # bias + ReLU, f32 on the VPU
    # --- Layer 2 on the MXU: (TB, H) @ (H, 128) with f32 accumulation; the output
    #     slab is a full 128-lane tile -> unmasked stores.
    o = jnp.dot(h, w2_ref[...], preferred_element_type=jnp.float32)
    out_ref[...] = (o + b2_ref[...]).astype(out_ref.dtype)


def net_forward(x, w1, b1, w2, b2, *, block_batch=512):
    """x: (B, n_feature); w1: (n_feature, n_hidden); b1: (1, n_hidden);
       w2: (n_hidden, n_output); b2: (1, n_output). Returns (B, n_output) f32."""
    B, F = x.shape
    H, O = w2.shape

    # Lane-dense output: zero-pad the tiny output projection to a full 128-lane slab.
    O_pad = max(_LANES, _round_up(O, _LANES))
    w2p = jnp.zeros((H, O_pad), w2.dtype).at[:, :O].set(w2)
    b2p = jnp.zeros((1, O_pad), b2.dtype).at[:, :O].set(b2)

    # Batch tiling: pick the largest tile <= block_batch, pad B so every block is full.
    TB = min(block_batch, _round_up(B, 8))
    B_pad = _round_up(B, TB)
    if B_pad != B:
        x = jnp.pad(x, ((0, B_pad - B), (0, 0)))
    nb = B_pad // TB

    cost = pl.CostEstimate(
        flops=2 * B_pad * (F * H + H * O_pad),
        bytes_accessed=4 * (B_pad * F + F * H + H + H * O_pad + O_pad + B_pad * O_pad),
        transcendentals=0,
    )

    out = pl.pallas_call(
        mlp_kernel,
        out_shape=jax.ShapeDtypeStruct((B_pad, O_pad), jnp.float32),
        grid=(nb,),
        in_specs=[
            pl.BlockSpec((TB, F), lambda i: (i, 0)),      # x: tiled over batch
            pl.BlockSpec((F, H), lambda i: (0, 0)),       # w1: VMEM-resident
            pl.BlockSpec((1, H), lambda i: (0, 0)),       # b1: VMEM-resident
            pl.BlockSpec((H, O_pad), lambda i: (0, 0)),   # w2 (lane-padded)
            pl.BlockSpec((1, O_pad), lambda i: (0, 0)),   # b2 (lane-padded)
        ],
        out_specs=pl.BlockSpec((TB, O_pad), lambda i: (i, 0)),
        compiler_params=pltpu.CompilerParams(
            dimension_semantics=("parallel",),            # shard batch tiles across TCs (v7x)
        ),
        cost_estimate=cost,
    )(x, w1, b1, w2p, b2p)

    return out[:B, :O]


def init_linear_params(key, in_features, out_features):
    """Deterministic init mimicking torch.nn.Linear's default U(-1/sqrt(fan_in), +1/sqrt(fan_in)).
    Weight is returned transposed: (in_features, out_features)."""
    kw, kb = jax.random.split(key)
    bound = 1.0 / jnp.sqrt(jnp.float32(in_features))
    w = jax.random.uniform(kw, (in_features, out_features), jnp.float32, -bound, bound)
    b = jax.random.uniform(kb, (1, out_features), jnp.float32, -bound, bound)
    return w, b


if __name__ == "__main__":
    # Shapes consistent with the module's usage (2-D points -> 2 classes).
    batch, n_feature, n_hidden, n_output = 256, 2, 32, 2

    key = jax.random.PRNGKey(0)
    k_x0, k_x1, k_l1, k_l2 = jax.random.split(key, 4)

    # Inputs analogous to the script's two Gaussian clusters around +2 / -2.
    x0 = 2.0 + jax.random.normal(k_x0, (batch // 2, n_feature), jnp.float32)
    x1 = -2.0 + jax.random.normal(k_x1, (batch // 2, n_feature), jnp.float32)
    x = jnp.concatenate([x0, x1], axis=0)

    w1, b1 = init_linear_params(k_l1, n_feature, n_hidden)
    w2, b2 = init_linear_params(k_l2, n_hidden, n_output)

    # block_batch=128 -> 2 batch tiles: exercises the pipelined grid + parallel axis.
    out = net_forward(x, w1, b1, w2, b2, block_batch=128)
    jax.block_until_ready(out)

    # Pure-JAX reference check of the fused kernel.
    ref = jnp.maximum(x @ w1 + b1, 0.0) @ w2 + b2
    assert out.shape == (batch, n_output)
    assert jnp.allclose(out, ref, atol=1e-5, rtol=1e-5)

    print("KERNEL_OK")
</pallas_src>

<mosaic_0001>
module attributes {stable_mosaic.version = 11 : i64} {
  func.func @mlp_kernel(%arg0: i32, %arg1: memref<128x2xf32, #tpu.memory_space<vmem>>, %arg2: memref<2x32xf32, #tpu.memory_space<vmem>>, %arg3: memref<1x32xf32, #tpu.memory_space<vmem>>, %arg4: memref<32x128xf32, #tpu.memory_space<vmem>>, %arg5: memref<1x128xf32, #tpu.memory_space<vmem>>, %arg6: memref<128x128xf32, #tpu.memory_space<vmem>>) attributes {dimension_semantics = [#tpu.dimension_semantics<parallel>], iteration_bounds = array<i64: 2>, scalar_prefetch = 0 : i64, scratch_operands = 0 : i64, tpu.core_type = #tpu.core_type<tc>, window_params = [{transform_indices = @transform_0, window_bounds = array<i64: 128, 2>}, {pipeline_mode = #tpu.pipeline_mode<synchronous>, transform_indices = @transform_1, window_bounds = array<i64: 2, 32>}, {pipeline_mode = #tpu.pipeline_mode<synchronous>, transform_indices = @transform_2, window_bounds = array<i64: 1, 32>}, {pipeline_mode = #tpu.pipeline_mode<synchronous>, transform_indices = @transform_3, window_bounds = array<i64: 32, 128>}, {pipeline_mode = #tpu.pipeline_mode<synchronous>, transform_indices = @transform_4, window_bounds = array<i64: 1, 128>}, {transform_indices = @transform_5, window_bounds = array<i64: 128, 128>}]} {
    %c0 = arith.constant 0 : index
    %c0_0 = arith.constant 0 : index
    %0 = vector.load %arg1[%c0, %c0_0] : memref<128x2xf32, #tpu.memory_space<vmem>>, vector<128x2xf32>
    %1 = vector.extract_strided_slice %0 {offsets = [0, 0], sizes = [128, 1], strides = [1, 1]} : vector<128x2xf32> to vector<128x1xf32>
    %c0_1 = arith.constant 0 : index
    %c0_2 = arith.constant 0 : index
    %2 = vector.load %arg2[%c0_1, %c0_2] : memref<2x32xf32, #tpu.memory_space<vmem>>, vector<1x32xf32>
    %3 = vector.broadcast %1 : vector<128x1xf32> to vector<128x32xf32>
    %4 = vector.broadcast %2 : vector<1x32xf32> to vector<128x32xf32>
    %5 = arith.mulf %3, %4 : vector<128x32xf32>
    %6 = vector.extract_strided_slice %0 {offsets = [0, 1], sizes = [128, 1], strides = [1, 1]} : vector<128x2xf32> to vector<128x1xf32>
    %c1 = arith.constant 1 : index
    %c0_3 = arith.constant 0 : index
    %7 = vector.load %arg2[%c1, %c0_3] : memref<2x32xf32, #tpu.memory_space<vmem>>, vector<1x32xf32>
    %8 = vector.broadcast %6 : vector<128x1xf32> to vector<128x32xf32>
    %9 = vector.broadcast %7 : vector<1x32xf32> to vector<128x32xf32>
    %10 = arith.mulf %8, %9 : vector<128x32xf32>
    %11 = arith.addf %5, %10 : vector<128x32xf32>
    %c0_4 = arith.constant 0 : index
    %c0_5 = arith.constant 0 : index
    %12 = vector.load %arg3[%c0_4, %c0_5] : memref<1x32xf32, #tpu.memory_space<vmem>>, vector<1x32xf32>
    %13 = vector.broadcast %12 : vector<1x32xf32> to vector<128x32xf32>
    %14 = arith.addf %11, %13 : vector<128x32xf32>
    %cst = arith.constant 0.000000e+00 : f32
    %15 = vector.broadcast %cst : f32 to vector<128x32xf32>
    %16 = arith.maximumf %14, %15 : vector<128x32xf32>
    %c0_6 = arith.constant 0 : index
    %c0_7 = arith.constant 0 : index
    %17 = vector.load %arg4[%c0_6, %c0_7] : memref<32x128xf32, #tpu.memory_space<vmem>>, vector<32x128xf32>
    %cst_8 = arith.constant dense<0.000000e+00> : vector<128x128xf32>
    %18 = tpu.matmul %16, %17, %cst_8 {dimension_numbers = #tpu.dot_dimension_numbers<[1], [0], [0], [1], [0, 0, 1, 1], [], []>} : vector<128x32xf32>, vector<32x128xf32>, vector<128x128xf32> -> vector<128x128xf32>
    %c0_9 = arith.constant 0 : index
    %c0_10 = arith.constant 0 : index
    %19 = vector.load %arg5[%c0_9, %c0_10] : memref<1x128xf32, #tpu.memory_space<vmem>>, vector<1x128xf32>
    %20 = vector.broadcast %19 : vector<1x128xf32> to vector<128x128xf32>
    %21 = arith.addf %18, %20 : vector<128x128xf32>
    %c0_11 = arith.constant 0 : index
    %c0_12 = arith.constant 0 : index
    %22 = vector.load %arg6[%c0_11, %c0_12] : memref<128x128xf32, #tpu.memory_space<vmem>>, vector<128x128xf32>
    tpu.vector_store %arg6[%c0_11, %c0_12], %21 {strides = array<i32>} : memref<128x128xf32, #tpu.memory_space<vmem>>, vector<128x128xf32>,
    return
  }
  func.func @transform_0(%arg0: i32) -> (i32, i32) {
    %c0_i32 = arith.constant 0 : i32
    %c0_i32_0 = arith.constant 0 : i32
    return %arg0, %c0_i32 : i32, i32
  }
  func.func @transform_1(%arg0: i32) -> (i32, i32) {
    %c0_i32 = arith.constant 0 : i32
    %c0_i32_0 = arith.constant 0 : i32
    %c0_i32_1 = arith.constant 0 : i32
    return %c0_i32, %c0_i32_0 : i32, i32
  }
  func.func @transform_2(%arg0: i32) -> (i32, i32) {
    %c0_i32 = arith.constant 0 : i32
    %c0_i32_0 = arith.constant 0 : i32
    %c0_i32_1 = arith.constant 0 : i32
    return %c0_i32, %c0_i32_0 : i32, i32
  }
  func.func @transform_3(%arg0: i32) -> (i32, i32) {
    %c0_i32 = arith.constant 0 : i32
    %c0_i32_0 = arith.constant 0 : i32
    %c0_i32_1 = arith.constant 0 : i32
    return %c0_i32, %c0_i32_0 : i32, i32
  }
  func.func @transform_4(%arg0: i32) -> (i32, i32) {
    %c0_i32 = arith.constant 0 : i32
    %c0_i32_0 = arith.constant 0 : i32
    %c0_i32_1 = arith.constant 0 : i32
    return %c0_i32, %c0_i32_0 : i32, i32
  }
  func.func @transform_5(%arg0: i32) -> (i32, i32) {
    %c0_i32 = arith.constant 0 : i32
    %c0_i32_0 = arith.constant 0 : i32
    return %arg0, %c0_i32 : i32, i32
  }
}

</mosaic_0001>

<bundles_post_ra>
// kernel: tpu_custom_call.1
= control target key start
LH: loop header
LB: loop body
LE: loop exit
PB: predicated region body
PF: predicated region fallthrough
CT: control target
= control target key end

     0   :  { %10 = vsyncpa [#allocation3], 0  ;;  %s1127_s0 = inlined_call_operand.vmem [shape: f32[256,2], index: 0, kind: input, shape index: {}]   ;;  %s1128_s1 = inlined_call_operand.vmem [shape: f32[2,32], index: 1, kind: input, shape index: {}]   ;;  %s1129_s2 = inlined_call_operand.vmem [shape: f32[1,32], index: 2, kind: input, shape index: {}]   ;;  %s1130_s3 = inlined_call_operand.vmem [shape: f32[32,128], index: 3, kind: input, shape index: {}]   ;;  %s1131_s4 = inlined_call_operand.vmem [shape: f32[1,128], index: 4, kind: input, shape index: {}]   ;;  %s1132_s5 = inlined_call_operand.hbm [shape: f32[256,128], index: 5, kind: output, shape index: {}]  }
   0x1   :  { %12 = vsyncpa [#allocation3 + $0x1], 0  ;;  %s892_s18 = smov 0   ;;  %s894_s19 = smov 0  }
   0x2   :  { %s896_s20 = smov 0   ;;  %s898_s21 = smov 0  }
   0x3 LB: > { %s913_s22 = sadd.s32 4294967295, %s856_s21   ;;  %s690_s23 = sadd.s32 4294967294, %s856_s21   ;;  %s856_s21 = sphi %s898_s21, %s1138_s21   ;;  %s852_s20 = sphi %s896_s20, %s1137_s20   ;;  %s848_s19 = sphi %s894_s19, %s1136_s19   ;;  %s844_s18 = sphi %s892_s18, %s1135_s18  }
   0x4   : > { %s917_s24 = sadd.s32 1, %s856_s21   ;;  %s135_s25 = sadd.s32 1, %s852_s20 }
   0x5   : > { %s132_s26 = ssub.s32 %s856_s21, %s917_s24  ;;  %p145_p0 = scmp.ne.s32.totalorder %s852_s20, %s848_s19 }
   0x6   : > { %p133_p1 = scmp.eq.s32.totalorder %s132_s26, 0  ;;  %p146_p2 = scmp.eq.s32.totalorder %s913_s22, 1 }
   0x7   : > { %p151_p3 = scmp.ne.s32.totalorder %s848_s19, %s844_s18  ;;  %p152_p4 = scmp.eq.s32.totalorder %s690_s23, 1 }
   0x8   : > { %s928_s27 = scalar_select %p133_p1, %s852_s20, %s135_s25  }
   0x9   : > { %p930_p5 = por %p146_p2, %p145_p0  ;;  %p934_p6 = por %p152_p4, %p151_p3 }
   0xa   : > { %p693_p7 = scmp.ge.s32.totalorder %s856_s21, 1  ;;  %p191_p8 = scmp.lt.s32.totalorder %s856_s21, 3 }
   0xc   : > { %p192_p9 = pnand %p693_p7, %p191_p8 }
   0xd   : > { %s695_s30 = sshll.u32 (!%p192_p9), %s913_s22, 4  ;;  %s216_s8 = sand.u32 (!%p192_p9), 1, %s848_s19  }
   0xe   : > { %195 = sbr.rel (%p192_p9) target bundleno = 372 (0x174), region = 40  ;;  %p220_p10 = scmp.lt.s32.totalorder (!%p192_p9), %s695_s30, 31 }
   0xf   : > { %s718_s13 = sshll.u32 (!%p192_p9), %s913_s22, 7  ;;  %s613_s25 = scalar_lea.sflag (!%p192_p9), [#allocation3], %s216_s8 }
  0x10   : > { %s624_s16 = scalar_lea.hbm (!%p192_p9), %s1132_s5, %s718_s13  ;;  %s814_s7 = scalar_lea.hbm (!%p192_p9), %s1132_s5, 256 }
  0x11   : > { %s627_s23 = sshll.u32 (!%p192_p9), %s624_s16, 4  ;;  %s628_s23 = int_to_ptr.hbm [resolvable:$true] %s627_s23 }
  0x12   : > { %s808_s26 = sshra.s32 (!%p192_p9), %s628_s23, 4  ;;  %s809_s26 = int_to_ptr.hbm [resolvable:$true] %s808_s26 }
  0x13   : > { %v858_v0 = vmov 1   ;;  %v859_v1 = vmov 0   ;;  %s1140_s30 = smov (!%p220_p10, %s695_s30), 31  ;;  %v477_v17 = vld [vmem:[%s1130_s3 + $0x18] sm:$0xff]  ;;  %v476_v18 = vld [vmem:[%s1130_s3 + $0x10] sm:$0xff]  ;;  %v475_v20 = vld [vmem:[%s1130_s3 + $0x8] sm:$0xff]  ;;  %p815_p0 = scmp.lt.s32.totalorder %s809_s26, %s1132_s5 }
  0x14   : > { %775 = vset.pattern.permute.xlu1 %v858_v0  ;;  %774 = vset.pattern.permute.xlu0 %v859_v1  ;;  %s696_s6 = sshll.u32 %s1140_s30, 3  ;;  %v474_v21 = vld [vmem:[%s1130_s3] sm:$0xff]  ;;  %vm482_vm0 = vcmask 261120   ;;  %s810_s22 = scalar_lea.hbm %s809_s26, 128 }
  0x15   : > { %776 = vset.pattern.permute.xlu2 %v859_v1  ;;  %s947_s9 = scalar_lea.vmem %s1127_s0, %s696_s6  ;;  %720 = vmatpush.msra.mxu2 %v477_v17  ;;  %v993_v25 = vld [vmem:[%s1128_s1] ss:$0 sm:$0xff]  ;;  %v998_v26 = vld [vmem:[%s1128_s1 + $0x1] ss:$0 sm:$0xff]  ;;  %p811_p11 = scmp.ne.s32.totalorder %s809_s26, %s810_s22 }
  0x16   : > { %v234_v2 = vld [vmem:[%s947_s9 + $0x40] sm:$0xff]  ;;  %v240_v6 = vld [vmem:[%s947_s9 + $0x70] sm:$0xff]  ;;  %v235_v7 = vld [vmem:[%s947_s9 + $0x48] sm:$0xff]  ;;  %721 = vmatpush.msra.mxu3 %v477_v17  ;;  %719 = vmatpush.msra.mxu1 %v477_v17  ;;  %p816_p1 = scmp.lt.s32.totalorder %s814_s7, %s810_s22 }
  0x17   : > { %v226_v3 = vld [vmem:[%s947_s9] sm:$0xff]  ;;  %374 = vperm.xlu1 %775, %v234_v2   ;;  %285 = vperm.xlu0 %774, %v234_v2   ;;  %v239_v8 = vld [vmem:[%s947_s9 + $0x68] sm:$0xff]  ;;  %v236_v11 = vld [vmem:[%s947_s9 + $0x50] sm:$0xff]  ;;  %p812_p12 = pnand %p811_p11, %p930_p5 }
  0x18   : > { %245 = vperm.xlu2 %776, %v226_v3   ;;  %v238_v4 = vld [vmem:[%s947_s9 + $0x60] sm:$0xff]  ;;  %v227_v9 = vld [vmem:[%s947_s9 + $0x8] sm:$0xff]  ;;  %v228_v12 = vld [vmem:[%s947_s9 + $0x10] sm:$0xff]  ;;  %723 = vmatpush.msra.mxu2 %v476_v18  ;;  %p817_p2 = por %p816_p1, %p815_p0 }
  0x19   : > { %v230_v5 = vld [vmem:[%s947_s9 + $0x20] sm:$0xff]  ;;  %v231_v10 = vld [vmem:[%s947_s9 + $0x28] sm:$0xff]  ;;  %v241_v13 = vld [vmem:[%s947_s9 + $0x78] sm:$0xff]  ;;  %724 = vmatpush.msra.mxu3 %v476_v18  ;;  %722 = vmatpush.msra.mxu1 %v476_v18  ;;  %p813_p13 = pneg %p812_p12 }
  0x1a   : > { %v232_v14 = vld [vmem:[%s947_s9 + $0x30] sm:$0xff]  ;;  %v229_v15 = vld [vmem:[%s947_s9 + $0x18] sm:$0xff]  ;;  %726 = vmatpush.msra.mxu2 %v475_v20  ;;  %543 = vmatpush.msra.mxu0 %v477_v17  ;;  %v1005_v31 = vld [vmem:[%s1129_s2] ss:$0 sm:$0xff] }
  0x1b   : > { %v237_v16 = vld [vmem:[%s947_s9 + $0x58] sm:$0xff]  ;;  %727 = vmatpush.msra.mxu3 %v475_v20  ;;  %725 = vmatpush.msra.mxu1 %v475_v20  ;;  %p818_p3 = pnand %p817_p2, %p813_p13 }
  0x1c   : > { %v233_v19 = vld [vmem:[%s947_s9 + $0x38] sm:$0xff]  ;;  %729 = vmatpush.msra.mxu2 %v474_v21  ;;  %544 = vmatpush.msra.mxu0 %v476_v18  ;;  %s694_s9 = sshll.u32 %s216_s8, 7 }
  0x1d   : > { %730 = vmatpush.msra.mxu3 %v474_v21  ;;  %728 = vmatpush.msra.mxu1 %v474_v21  ;;  %s1075_s12 = scalar_lea.vmem [#allocation2], %s694_s9 }
  0x1e   : > { %545 = vmatpush.msra.mxu0 %v475_v20  ;;  %s625_s17 = sshll.u32 %s1075_s12, 4  ;;  %s626_s17 = int_to_ptr.vmem [resolvable:$true] %s625_s17 }
  0x1f   : > { %390 = vperm.xlu1 %775, %v238_v4   ;;  %305 = vperm.xlu0 %774, %v238_v4  }
  0x20   : > { %265 = vperm.xlu2 %776, %v230_v5   ;;  %546 = vmatpush.msra.mxu0 %v474_v21 }
  0x27   : > { %315 = vperm.xlu0 %774, %v240_v6   ;;  %358 = vperm.xlu1 %775, %v230_v5  }
  0x28   : > { %290 = vperm.xlu2 %776, %v235_v7  }
  0x2f   : > { %781 = vset.pattern.permute.xlu0 %v858_v0  ;;  %777 = vset.pattern.permute.xlu1 %v859_v1 }
  0x30   : > { %310 = vperm.xlu1 %777, %v239_v8   ;;  %342 = vperm.xlu0 %781, %v226_v3  }
  0x31   : > { %778 = vset.pattern.permute.xlu2 %v858_v0 }
  0x32   : > { %378 = vperm.xlu2 %778, %v235_v7  }
  0x38   : > { %250 = vperm.xlu1 %777, %v227_v9   ;;  %394 = vperm.xlu0 %781, %v239_v8  }
  0x3a   : > { %779 = vset.pattern.permute.xlu2 %v859_v1 }
  0x3b   : > { %270 = vperm.xlu2 %779, %v231_v10  }
  0x40   : > { %780 = vset.pattern.permute.xlu1 %v858_v0  ;;  %346 = vperm.xlu0 %781, %v227_v9  }
  0x41   : > { %362 = vperm.xlu1 %780, %v231_v10  }
  0x43   : > { %295 = vperm.xlu2 %779, %v236_v11  }
  0x48   : > { %350 = vperm.xlu0 %781, %v228_v12  }
  0x49   : > { %382 = vperm.xlu1 %780, %v236_v11  }
  0x4b   : > { %782 = vset.pattern.permute.xlu2 %v858_v0 }
  0x4c   : > { %398 = vperm.xlu2 %782, %v240_v6  }
  0x50   : > { %402 = vperm.xlu0 %781, %v241_v13  }
  0x51   : > { %783 = vset.pattern.permute.xlu1 %v859_v1 }
  0x52   : > { %255 = vperm.xlu1 %783, %v228_v12  }
  0x54   : > { %784 = vset.pattern.permute.xlu2 %v859_v1 }
  0x55   : > { %275 = vperm.xlu2 %784, %v232_v14  }
  0x58   : > { %354 = vperm.xlu0 %781, %v229_v15  }
  0x5a   : > { %785 = vset.pattern.permute.xlu1 %v858_v0 }
  0x5b   : > { %366 = vperm.xlu1 %785, %v232_v14  }
  0x5d   : > { %300 = vperm.xlu2 %784, %v237_v16  }
  0x63   : > { %786 = vset.pattern.permute.xlu1 %v859_v1 }
  0x64   : > { %320 = vperm.xlu1 %786, %v241_v13  }
  0x65   : > { %787 = vset.pattern.permute.xlu2 %v858_v0 }
  0x66   : > { %386 = vperm.xlu2 %787, %v237_v16  }
  0x6c   : > { %260 = vperm.xlu1 %786, %v229_v15  }
  0x6e   : > { %788 = vset.pattern.permute.xlu2 %v859_v1 }
  0x6f   : > { %280 = vperm.xlu2 %788, %v233_v19  }
  0x72   : > { %v246_v22 = vpop.permute.xlu2 %245 }
  0x73   : > { %v324_v59 = vmul.f32 %v993_v25, %v246_v22 }
  0x74   : > { %789 = vset.pattern.permute.xlu1 %v858_v0 }
  0x75   : > { %370 = vperm.xlu1 %789, %v233_v19  }
  0x7a   : > { %v266_v23 = vpop.permute.xlu2 %265 }
  0x7b   : > { %v328_v51 = vmul.f32 %v993_v25, %v266_v23 }
  0x82   : > { %v291_v24 = vpop.permute.xlu2 %290 }
  0x83   : > { %v333_v32 = vmul.f32 %v993_v25, %v291_v24 }
  0x89   : > { %v375_v27 = vpop.permute.xlu1 %374  ;;  %v286_v28 = vpop.permute.xlu0 %285 }
  0x8a   : > { %v414_v29 = vmul.f32 %v998_v26, %v375_v27  ;;  %v332_v30 = vmul.f32 %v993_v25, %v286_v28 }
  0x8c   : > { %v430_v33 = vadd.f32 %v414_v29, %v332_v30  ;;  %v379_v34 = vpop.permute.xlu2 %378 }
  0x8d   : > { %v415_v35 = vmul.f32 %v998_v26, %v379_v34 }
  0x8e   : > { %v450_v36 = vadd.f32 %v1005_v31, %v430_v33 }
  0x8f   : > { %v431_v37 = vadd.f32 %v415_v35, %v333_v32 }
  0x90   : > { %v466_v38 = vmax.f32 %v450_v36, 0.0 }
  0x91   : > { %v391_v39 = vpop.permute.xlu1 %390  ;;  %v306_v40 = vpop.permute.xlu0 %305  ;;  %v451_v43 = vadd.f32 %v1005_v31, %v431_v37 }
  0x92   : > { %v418_v41 = vmul.f32 %v998_v26, %v391_v39  ;;  %v336_v42 = vmul.f32 %v993_v25, %v306_v40  ;;  %705 = vmatmul.msk.f32.vlgmr.msra.gmra.mxu2 %vm482_vm0, %v466_v38 }
  0x93   : > { %v467_v47 = vmax.f32 %v451_v43, 0.0 }
  0x94   : > { %v434_v44 = vadd.f32 %v418_v41, %v336_v42 }
  0x95   : > { %v271_v45 = vpop.permute.xlu2 %270 }
  0x96   : > { %v454_v46 = vadd.f32 %v1005_v31, %v434_v44  ;;  %v329_v12 = vmul.f32 %v993_v25, %v271_v45 }
  0x98   : > { %v470_v48 = vmax.f32 %v454_v46, 0.0 }
  0x99   : > { %v359_v49 = vpop.permute.xlu1 %358  ;;  %v316_v50 = vpop.permute.xlu0 %315 }
  0x9a   : > { %v410_v52 = vmul.f32 %v998_v26, %v359_v49  ;;  %709 = vmatmul.msk.f32.vlgmr.msra.gmra.mxu3 %vm482_vm0, %v470_v48  ;;  %706 = vmatmul.msk.f32.gmra.mxu2 %vm482_vm0, %v467_v47  ;;  %v338_v5 = vmul.f32 %v993_v25, %v316_v50 }
  0x9c   : > { %v426_v53 = vadd.f32 %v410_v52, %v328_v51 }
  0x9d   : > { %v296_v54 = vpop.permute.xlu2 %295 }
  0x9e   : > { %v446_v55 = vadd.f32 %v1005_v31, %v426_v53  ;;  %v334_v30 = vmul.f32 %v993_v25, %v296_v54 }
  0xa0   : > { %v462_v56 = vmax.f32 %v446_v55, 0.0 }
  0xa2   : > { %v311_v57 = vpop.permute.xlu1 %310  ;;  %v343_v58 = vpop.permute.xlu0 %342  ;;  %701 = vmatmul.msk.f32.vlgmr.msra.gmra.mxu1 %vm482_vm0, %v462_v56 }
  0xa3   : > { %v406_v60 = vmul.f32 %v998_v26, %v343_v58  ;;  %v337_v3 = vmul.f32 %v993_v25, %v311_v57 }
  0xa5   : > { %v422_v61 = vadd.f32 %v406_v60, %v324_v59 }
  0xa6   : > { %v399_v62 = vpop.permute.xlu2 %398 }
  0xa7   : > { %v442_v63 = vadd.f32 %v1005_v31, %v422_v61  ;;  %v420_v6 = vmul.f32 %v998_v26, %v399_v62 }
  0xa9   : > { %v458_v0 = vmax.f32 %v442_v63, 0.0  ;;  %v436_v10 = vadd.f32 %v420_v6, %v338_v5 }
  0xaa   : > { %v251_v1 = vpop.permute.xlu1 %250  ;;  %v395_v2 = vpop.permute.xlu0 %394 }
  0xab   : > { %v419_v4 = vmul.f32 %v998_v26, %v395_v2  ;;  %697 = vmatmul.msk.f32.vlgmr.msra.gmra.mxu0 %vm482_vm0, %v458_v0  ;;  %v325_v14 = vmul.f32 %v993_v25, %v251_v1  ;;  %v456_v19 = vadd.f32 %v1005_v31, %v436_v10 }
  0xad   : > { %v435_v7 = vadd.f32 %v419_v4, %v337_v3  ;;  %v472_v27 = vmax.f32 %v456_v19, 0.0 }
  0xaf   : > { %v455_v8 = vadd.f32 %v1005_v31, %v435_v7  ;;  %v276_v9 = vpop.permute.xlu2 %275 }
  0xb0   : > { %v330_v49 = vmul.f32 %v993_v25, %v276_v9 }
  0xb1   : > { %v471_v11 = vmax.f32 %v455_v8, 0.0 }
  0xb2   : > { %v347_v13 = vpop.permute.xlu0 %346 }
  0xb3   : > { %v407_v15 = vmul.f32 %v998_v26, %v347_v13  ;;  %v363_v16 = vpop.permute.xlu1 %362  ;;  %710 = vmatmul.msk.f32.gmra.mxu3 %vm482_vm0, %v471_v11 }
  0xb4   : > { %v411_v17 = vmul.f32 %v998_v26, %v363_v16 }
  0xb5   : > { %v423_v18 = vadd.f32 %v407_v15, %v325_v14 }
  0xb6   : > { %v427_v20 = vadd.f32 %v411_v17, %v329_v12  ;;  %v793_v12 = vld [vmem:[%s1131_s4] ss:$0 sm:$0xff] }
  0xb7   : > { %v443_v21 = vadd.f32 %v1005_v31, %v423_v18  ;;  %v301_v22 = vpop.permute.xlu2 %300 }
  0xb8   : > { %v447_v23 = vadd.f32 %v1005_v31, %v427_v20  ;;  %v335_v34 = vmul.f32 %v993_v25, %v301_v22 }
  0xb9   : > { %v459_v24 = vmax.f32 %v443_v21, 0.0 }
  0xba   : > { %v463_v28 = vmax.f32 %v447_v23, 0.0  ;;  %v351_v40 = vpop.permute.xlu0 %350 }
  0xbb   : > { %v383_v29 = vpop.permute.xlu1 %382  ;;  %698 = vmatmul.msk.f32.gmra.mxu0 %vm482_vm0, %v459_v24  ;;  %711 = vmatmul.msk.f32.gmra.mxu3 %vm482_vm0, %v472_v27  ;;  %v408_v42 = vmul.f32 %v998_v26, %v351_v40 }
  0xbc   : > { %v416_v32 = vmul.f32 %v998_v26, %v383_v29  ;;  %702 = vmatmul.msk.f32.gmra.mxu1 %vm482_vm0, %v463_v28 }
  0xbe   : > { %v432_v33 = vadd.f32 %v416_v32, %v334_v30 }
  0xc0   : > { %v452_v35 = vadd.f32 %v1005_v31, %v432_v33  ;;  %v387_v36 = vpop.permute.xlu2 %386 }
  0xc1   : > { %v417_v37 = vmul.f32 %v998_v26, %v387_v36 }
  0xc2   : > { %v468_v38 = vmax.f32 %v452_v35, 0.0  ;;  %v403_v53 = vpop.permute.xlu0 %402 }
  0xc3   : > { %v433_v39 = vadd.f32 %v417_v37, %v335_v34  ;;  %v421_v57 = vmul.f32 %v998_v26, %v403_v53 }
  0xc4   : > { %v256_v41 = vpop.permute.xlu1 %255  ;;  %707 = vmatmul.msk.f32.gmra.mxu2 %vm482_vm0, %v468_v38 }
  0xc5   : > { %v326_v43 = vmul.f32 %v993_v25, %v256_v41  ;;  %v453_v44 = vadd.f32 %v1005_v31, %v433_v39 }
  0xc7   : > { %v424_v45 = vadd.f32 %v408_v42, %v326_v43  ;;  %v469_v46 = vmax.f32 %v453_v44, 0.0 }
  0xc9   : > { %v444_v47 = vadd.f32 %v1005_v31, %v424_v45  ;;  %v281_v4 = vpop.permute.xlu2 %280 }
  0xca   : > { %v355_v61 = vpop.permute.xlu0 %354  ;;  %v331_v6 = vmul.f32 %v993_v25, %v281_v4 }
  0xcb   : > { %v460_v48 = vmax.f32 %v444_v47, 0.0  ;;  %v409_v0 = vmul.f32 %v998_v26, %v355_v61 }
  0xcc   : > { %708 = vmatmul.msk.f32.gmra.mxu2 %vm482_vm0, %v469_v46 }
  0xcd   : > { %v367_v50 = vpop.permute.xlu1 %366  ;;  %699 = vmatmul.msk.f32.gmra.mxu0 %vm482_vm0, %v460_v48 }
  0xce   : > { %v412_v51 = vmul.f32 %v998_v26, %v367_v50 }
  0xd0   : > { %v428_v52 = vadd.f32 %v412_v51, %v330_v49 }
  0xd2   : > { %v448_v54 = vadd.f32 %v1005_v31, %v428_v52 }
  0xd4   : > { %v464_v55 = vmax.f32 %v448_v54, 0.0 }
  0xd6   : > { %v321_v56 = vpop.permute.xlu1 %320  ;;  %703 = vmatmul.msk.f32.gmra.mxu1 %vm482_vm0, %v464_v55 }
  0xd7   : > { %v339_v58 = vmul.f32 %v993_v25, %v321_v56 }
  0xd9   : > { %v437_v59 = vadd.f32 %v421_v57, %v339_v58 }
  0xdb   : > { %v457_v60 = vadd.f32 %v1005_v31, %v437_v59 }
  0xdd   : > { %v473_v62 = vmax.f32 %v457_v60, 0.0 }
  0xde   : > { %v261_v63 = vpop.permute.xlu1 %260 }
  0xdf   : > { %v327_v1 = vmul.f32 %v993_v25, %v261_v63  ;;  %712 = vmatmul.msk.f32.gmra.mxu3 %vm482_vm0, %v473_v62 }
  0xe1   : > { %v425_v2 = vadd.f32 %v409_v0, %v327_v1 }
  0xe3   : > { %v445_v3 = vadd.f32 %v1005_v31, %v425_v2 }
  0xe5   : > { %v461_v5 = vmax.f32 %v445_v3, 0.0 }
  0xe7   : > { %v371_v7 = vpop.permute.xlu1 %370  ;;  %700 = vmatmul.msk.f32.gmra.mxu0 %vm482_vm0, %v461_v5 }
  0xe8   : > { %v413_v8 = vmul.f32 %v998_v26, %v371_v7 }
  0xea   : > { %v429_v9 = vadd.f32 %v413_v8, %v331_v6 }
  0xec   : > { %v449_v10 = vadd.f32 %v1005_v31, %v429_v9 }
  0xee   : > { %v465_v11 = vmax.f32 %v449_v10, 0.0 }
  0xf0   : > { %704 = vmatmul.msk.f32.gmra.mxu1 %vm482_vm0, %v465_v11 }
 0x115   : > { %v572_v13 = vpop.f32.mrf.mxu2 }
 0x116   : > { %v573_v25 = vadd.f32 %v793_v12, %v572_v13 }
 0x118   : > { %604 = vst [vmem:[%s1075_s12 + $0x40] sm:$0xff] %v573_v25 }
 0x11d   : > { %v575_v26 = vpop.f32.mrf.mxu2  ;;  %v584_v31 = vpop.f32.mrf.mxu3 }
 0x11e   : > { %v576_v14 = vadd.f32 %v793_v12, %v575_v26  ;;  %v585_v15 = vadd.f32 %v793_v12, %v584_v31 }
 0x11f   : > { %v560_v16 = vpop.f32.mrf.mxu1 }
 0x120   : > { %605 = vst [vmem:[%s1075_s12 + $0x48] sm:$0xff] %v576_v14  ;;  %v561_v17 = vadd.f32 %v793_v12, %v560_v16 }
 0x121   : > { %608 = vst [vmem:[%s1075_s12 + $0x60] sm:$0xff] %v585_v15 }
 0x122   : > { %600 = vst [vmem:[%s1075_s12 + $0x20] sm:$0xff] %v561_v17 }
 0x128   : > { %v548_v18 = vpop.f32.mrf.mxu0 }
 0x129   : > { %v549_v19 = vadd.f32 %v793_v12, %v548_v18 }
 0x12b   : > { %596 = vst [vmem:[%s1075_s12] sm:$0xff] %v549_v19 }
 0x136   : > { %v587_v20 = vpop.f32.mrf.mxu3 }
 0x137   : > { %v588_v21 = vadd.f32 %v793_v12, %v587_v20 }
 0x138   : > { %v551_v22 = vpop.f32.mrf.mxu0 }
 0x139   : > { %609 = vst [vmem:[%s1075_s12 + $0x68] sm:$0xff] %v588_v21  ;;  %v552_v23 = vadd.f32 %v793_v12, %v551_v22  ;;  %v563_v24 = vpop.f32.mrf.mxu1 }
 0x13a   : > { %v564_v27 = vadd.f32 %v793_v12, %v563_v24 }
 0x13b   : > { %597 = vst [vmem:[%s1075_s12 + $0x8] sm:$0xff] %v552_v23 }
 0x13c   : > { %601 = vst [vmem:[%s1075_s12 + $0x28] sm:$0xff] %v564_v27 }
 0x13e   : > { %v590_v28 = vpop.f32.mrf.mxu3 }
 0x13f   : > { %v591_v29 = vadd.f32 %v793_v12, %v590_v28 }
 0x141   : > { %610 = vst [vmem:[%s1075_s12 + $0x70] sm:$0xff] %v591_v29 }
 0x147   : > { %v578_v30 = vpop.f32.mrf.mxu2 }
 0x148   : > { %v579_v32 = vadd.f32 %v793_v12, %v578_v30 }
 0x14a   : > { %606 = vst [vmem:[%s1075_s12 + $0x50] sm:$0xff] %v579_v32  ;;  %v554_v33 = vpop.f32.mrf.mxu0 }
 0x14b   : > { %v555_v34 = vadd.f32 %v793_v12, %v554_v33 }
 0x14d   : > { %598 = vst [vmem:[%s1075_s12 + $0x10] sm:$0xff] %v555_v34 }
 0x14f   : > { %v581_v35 = vpop.f32.mrf.mxu2 }
 0x150   : > { %v582_v36 = vadd.f32 %v793_v12, %v581_v35 }
 0x152   : > { %607 = vst [vmem:[%s1075_s12 + $0x58] sm:$0xff] %v582_v36 }
 0x153   : > { %v566_v37 = vpop.f32.mrf.mxu1 }
 0x154   : > { %v567_v38 = vadd.f32 %v793_v12, %v566_v37 }
 0x156   : > { %602 = vst [vmem:[%s1075_s12 + $0x30] sm:$0xff] %v567_v38 }
 0x162   : > { %v593_v39 = vpop.f32.mrf.mxu3 }
 0x163   : > { %v594_v40 = vadd.f32 %v793_v12, %v593_v39 }
 0x164   : > { %v557_v41 = vpop.f32.mrf.mxu0 }
 0x165   : > { %611 = vst [vmem:[%s1075_s12 + $0x78] sm:$0xff] %v594_v40  ;;  %v558_v42 = vadd.f32 %v793_v12, %v557_v41 }
 0x167   : > { %599 = vst [vmem:[%s1075_s12 + $0x18] sm:$0xff] %v558_v42 }
 0x16d   : > { %v569_v43 = vpop.f32.mrf.mxu1 }
 0x16e   : > { %v570_v44 = vadd.f32 %v793_v12, %v569_v43 }
 0x170   : > { %603 = vst [vmem:[%s1075_s12 + $0x38] sm:$0xff] %v570_v44 }
 0x171   : > { %821 = shalt.err (!%p818_p3)
}
 0x172   : > { %s860_s8 = smov 128   ;;  %s861_s11 = smov 8  }
 0x173   : > { %731 = dma.vmem_to_hbm [thread:$0]  (%p930_p5), %s626_s17, 2048, %s628_s23, %s613_s25, %s860_s8, %s860_s8, %s861_s11  }
 0x174 PF: > { %p737_p4 = scmp.ge.s32.totalorder %s856_s21, 2  ;;  %s642_s12 = sand.u32 1, %s844_s18  }
 0x175   : > { %s643_s13 = scalar_lea.sflag [#allocation3], %s642_s12 }
 0x176   : > { %p734_p7 = pnand %p737_p4, %p934_p6 }
 0x178   : > { %p735_p8 = pneg %p734_p7 }
 0x17a   : > { %839 = dma.done.wait (%p735_p8), %s643_s13, 2048  }
 0x17b   : > { %841 = vsyncadd (%p735_p8), %s643_s13, 4294965248  ;;  %p15_p9 = scmp.ge.s32.totalorder %s917_s24, 4   ;;  %s1135_s18 = smov %s848_s19 }
 0x17c   : > { %s1136_s19 = smov %s852_s20  ;;  %s1137_s20 = smov %s928_s27 }
 0x17d   : > { %s1138_s21 = smov %s917_s24  ;;  %17 = sbr.rel (!%p15_p9) target bundleno = 3 (0x3), region = 75 }
 0x182   :  { %649 = vsyncpa [#allocation3], 1 }
 0x183   :  { %651 = vsyncpa [#allocation3 + $0x1], 1 }

</bundles_post_ra>
